<compile_context>
chip_gen: v6e
topology: v6e:2x2x1
jax: 0.10.0
libtpu: 0.0.40
codegen_flags: <defaults>
</compile_context>

<pallas_src>
import functools

import numpy as np
import jax
import jax.numpy as jnp
from jax.experimental import pallas as pl
from jax.experimental.pallas import tpu as pltpu


def _round_up(x: int, m: int) -> int:
    return ((x + m - 1) // m) * m


def _bilinear_weight_matrix(out_size: int, in_size: int, padded_out: int) -> np.ndarray:
    """W of shape (padded_out, in_size); (W @ signal)[:out_size] is the bilinear
    resize and rows >= out_size are all zero (zero-pad folded into the matmul).

    Half-pixel-center bilinear (PyTorch align_corners=False), source index
    clamped at 0, at most two non-zeros per row.
    """
    scale = in_size / out_size
    i = np.arange(out_size, dtype=np.float64)
    src = np.maximum((i + 0.5) * scale - 0.5, 0.0)
    x0 = np.minimum(np.floor(src).astype(np.int64), in_size - 1)
    x1 = np.minimum(x0 + 1, in_size - 1)
    w1 = src - x0.astype(np.float64)
    w0 = 1.0 - w1
    W = np.zeros((padded_out, in_size), dtype=np.float64)
    rows = np.arange(out_size)
    # use add so the x0 == x1 (edge) case still sums to 1
    np.add.at(W, (rows, x0), w0)
    np.add.at(W, (rows, x1), w1)
    return W.astype(np.float32)


def _resize_kernel(img_ref, wh_ref, wwt_ref, out_ref, *, rows_first: bool, compute_dtype):
    # img_ref : (cc, OH, OW)  original dtype — upcast at the load
    # wh_ref  : (th, OH)      compute dtype — row-interp weights (zero rows >= nh)
    # wwt_ref : (OW, W)       compute dtype — col-interp weights^T (zero cols >= nw)
    # out_ref : (cc, th, W)   f32
    img = img_ref[...].astype(compute_dtype)
    wh = wh_ref[...]
    wwt = wwt_ref[...]
    if rows_first:
        tmp = jnp.einsum("ro,cop->crp", wh, img,
                         preferred_element_type=jnp.float32)          # (cc, th, OW)
        res = jnp.einsum("crp,pw->crw", tmp.astype(compute_dtype), wwt,
                         preferred_element_type=jnp.float32)          # (cc, th, W)
    else:
        tmp = jnp.einsum("cop,pw->cow", img, wwt,
                         preferred_element_type=jnp.float32)          # (cc, OH, W)
        res = jnp.einsum("ro,cow->crw", wh, tmp.astype(compute_dtype),
                         preferred_element_type=jnp.float32)          # (cc, th, W)
    out_ref[...] = res.astype(out_ref.dtype)                          # full-block store


def resize(img: jnp.ndarray, size, *, use_bf16: bool = False,
           vmem_budget_bytes: int = 20 * 1024 * 1024) -> jnp.ndarray:
    """Pallas equivalent of the PyTorch `Resize` module's forward."""
    if isinstance(size, float):
        h, w = int(size), int(size)
    elif isinstance(size, tuple):
        h, w = int(size[0]), int(size[1])
    else:
        h, w = int(size), int(size)

    c, oh, ow = img.shape
    if oh > ow:
        nh = h
        nw = int(h / oh * ow)
    else:
        nw = w
        nh = int(w / ow * oh)
    # Clamp to the canvas (the torch reference would error for pathological ratios).
    nh = min(nh, h)
    nw = min(nw, w)

    compute_dtype = jnp.bfloat16 if use_bf16 else jnp.float32
    wt_bytes = 2 if use_bf16 else 4
    img_bytes = jnp.dtype(img.dtype).itemsize

    # Weights built with numpy at trace time; padding folded in; compute dtype on host.
    wh = jnp.asarray(_bilinear_weight_matrix(nh, oh, h)).astype(compute_dtype)    # (h, oh)
    wwt = jnp.asarray(_bilinear_weight_matrix(nw, ow, w).T).astype(compute_dtype)  # (ow, w)

    # ---- budget-driven tile selection (cc channels, th output rows per step) ----
    def step_bytes(cc, th):
        b = 2 * cc * oh * ow * img_bytes          # double-buffered image block
        b += 2 * cc * th * w * 4                  # double-buffered output block
        b += 2 * (h * oh + ow * w) * wt_bytes     # weights (conservatively x2)
        b += cc * max(th * ow, oh * w) * 4        # matmul intermediate
        return b

    cc, th = c, h
    if step_bytes(cc, th) > vmem_budget_bytes:
        cc = 1
    if step_bytes(cc, th) > vmem_budget_bytes:
        cand = [t for t in (1024, 512, 256, 128, 64, 32, 16, 8) if t < h]
        fitting = [t for t in cand if step_bytes(cc, t) <= vmem_budget_bytes]
        if fitting:
            divisors = [t for t in fitting if h % t == 0]
            th = divisors[0] if divisors else fitting[0]
        elif cand:
            th = cand[-1]
    n_c = pl.cdiv(c, cc)
    n_r = pl.cdiv(h, th)

    # Contraction order: minimize MXU-tile-padded work (not raw intermediate size).
    if n_r > 1:
        rows_first = True  # avoid recomputing the (OH, W) intermediate per row tile
    else:
        r = lambda x: _round_up(x, 128)
        cost_rows = r(h) * r(oh) * r(ow) + r(h) * r(ow) * r(w)
        cost_cols = r(oh) * r(ow) * r(w) + r(h) * r(oh) * r(w)
        rows_first = cost_rows <= cost_cols

    flops_per_c = (2 * (h * oh * ow + h * ow * w) if rows_first
                   else 2 * (oh * ow * w + h * oh * w))
    cost = pl.CostEstimate(
        flops=int(c * flops_per_c),
        transcendentals=0,
        bytes_accessed=int(c * (oh * ow * img_bytes + h * w * 4)
                           + (h * oh + ow * w) * wt_bytes),
    )

    est = step_bytes(cc, th)
    vmem_limit = None
    if est > 30 * 1024 * 1024:
        # Huge sources that can't be tiled further: raise the scoped VMEM limit.
        vmem_limit = min(int(est * 1.2), 100 * 1024 * 1024)

    kernel = functools.partial(_resize_kernel, rows_first=rows_first,
                               compute_dtype=compute_dtype)

    return pl.pallas_call(
        kernel,
        out_shape=jax.ShapeDtypeStruct((c, h, w), jnp.float32),
        grid=(n_c, n_r),
        in_specs=[
            pl.BlockSpec((cc, oh, ow), lambda ci, ri: (ci, 0, 0)),
            pl.BlockSpec((th, oh), lambda ci, ri: (ri, 0)),
            pl.BlockSpec((ow, w), lambda ci, ri: (0, 0)),
        ],
        out_specs=pl.BlockSpec((cc, th, w), lambda ci, ri: (ci, ri, 0)),
        compiler_params=pltpu.CompilerParams(
            dimension_semantics=("parallel", "parallel"),
            vmem_limit_bytes=vmem_limit,
        ),
        cost_estimate=cost,
    )(img, wh, wwt)   # original dtype in; upcast happens in-kernel


if __name__ == "__main__":
    key = jax.random.PRNGKey(0)
    k1, k2 = jax.random.split(key)

    def reference(img, size):
        c, oh, ow = img.shape
        h, w = size
        if oh > ow:
            nh, nw = h, int(h / oh * ow)
        else:
            nw, nh = w, int(w / ow * oh)
        nh, nw = min(nh, h), min(nw, w)
        wh_u = jnp.asarray(_bilinear_weight_matrix(nh, oh, nh))   # (nh, oh) unpadded
        ww_u = jnp.asarray(_bilinear_weight_matrix(nw, ow, nw))   # (nw, ow) unpadded
        resized = jnp.einsum("no,cop,wp->cnw", wh_u, img.astype(jnp.float32), ww_u)
        return jnp.zeros((c, h, w), jnp.float32).at[:, :nh, :nw].set(resized)

    # --- Test 1: small image, OH > OW; all channels + rows in one grid step (f32, exact) ---
    img1 = jax.random.uniform(k1, (3, 16, 12), dtype=jnp.float32)
    size1 = (8, 8)
    out1 = jax.block_until_ready(resize(img1, size1))
    ref1 = reference(img1, size1)
    nh1, nw1 = 8, int(8 / 16 * 12)
    assert out1.shape == (3, 8, 8), out1.shape
    assert bool(jnp.all(jnp.isfinite(out1)))
    assert bool(jnp.all(out1[:, :, nw1:] == 0.0))       # padded cols exactly zero
    assert bool(jnp.all(out1[:, nh1:, :] == 0.0))       # padded rows exactly zero
    assert bool(jnp.allclose(out1, ref1, atol=1e-5, rtol=1e-5))

    # --- Test 2: OW > OH upscale; tiny budget forces channel + output-row tiling ---
    img2 = jax.random.uniform(k2, (3, 24, 32), dtype=jnp.float32)
    size2 = (64, 64)
    out2 = jax.block_until_ready(resize(img2, size2, vmem_budget_bytes=64 * 1024))
    ref2 = reference(img2, size2)
    assert out2.shape == (3, 64, 64), out2.shape
    assert bool(jnp.allclose(out2, ref2, atol=1e-5, rtol=1e-5))

    # --- Test 3: bf16 MXU operands (v6e/v7x fast path) — padding exact, interior ~bf16 ---
    out3 = jax.block_until_ready(resize(img1, size1, use_bf16=True))
    assert bool(jnp.all(out3[:, :, nw1:] == 0.0))
    assert bool(jnp.all(out3[:, nh1:, :] == 0.0))
    assert bool(jnp.allclose(out3, ref1, atol=3e-2, rtol=3e-2))

    print("KERNEL_OK")
</pallas_src>

<mosaic_0001>
module attributes {stable_mosaic.version = 11 : i64} {
  func.func @_resize_kernel(%arg0: i32, %arg1: i32, %arg2: memref<3x16x12xf32, #tpu.memory_space<vmem>>, %arg3: memref<8x16xf32, #tpu.memory_space<vmem>>, %arg4: memref<12x8xf32, #tpu.memory_space<vmem>>, %arg5: memref<3x8x8xf32, #tpu.memory_space<vmem>>) attributes {dimension_semantics = [#tpu.dimension_semantics<parallel>, #tpu.dimension_semantics<parallel>], iteration_bounds = array<i64: 1, 1>, scalar_prefetch = 0 : i64, scratch_operands = 0 : i64, tpu.core_type = #tpu.core_type<tc>, window_params = [{transform_indices = @transform_0, window_bounds = array<i64: 3, 16, 12>}, {transform_indices = @transform_1, window_bounds = array<i64: 8, 16>}, {pipeline_mode = #tpu.pipeline_mode<synchronous>, transform_indices = @transform_2, window_bounds = array<i64: 12, 8>}, {transform_indices = @transform_3, window_bounds = array<i64: 3, 8, 8>}]} {
    %c0 = arith.constant 0 : index
    %c0_0 = arith.constant 0 : index
    %c0_1 = arith.constant 0 : index
    %0 = vector.load %arg2[%c0, %c0_0, %c0_1] : memref<3x16x12xf32, #tpu.memory_space<vmem>>, vector<3x16x12xf32>
    %c0_2 = arith.constant 0 : index
    %c0_3 = arith.constant 0 : index
    %1 = vector.load %arg3[%c0_2, %c0_3] : memref<8x16xf32, #tpu.memory_space<vmem>>, vector<8x16xf32>
    %c0_4 = arith.constant 0 : index
    %c0_5 = arith.constant 0 : index
    %2 = vector.load %arg4[%c0_4, %c0_5] : memref<12x8xf32, #tpu.memory_space<vmem>>, vector<12x8xf32>
    "tpu.trace_start"() <{level = 10 : i32, message = "ro,cop->crp"}> : () -> ()
    %cst = arith.constant dense<0.000000e+00> : vector<3x12x8xf32>
    %3 = tpu.matmul %0, %1, %cst {dimension_numbers = #tpu.dot_dimension_numbers<[1], [1], [0, 2], [0], [0, 0, 0, 2, 1, 0], [], []>} : vector<3x16x12xf32>, vector<8x16xf32>, vector<3x12x8xf32> -> vector<3x12x8xf32>
    %4 = tpu.transpose %3, [0, 2, 1] : vector<3x12x8xf32> -> vector<3x8x12xf32>
    "tpu.trace_stop"() : () -> ()
    "tpu.trace_start"() <{level = 10 : i32, message = "crp,pw->crw"}> : () -> ()
    %cst_6 = arith.constant dense<0.000000e+00> : vector<3x8x8xf32>
    %5 = tpu.matmul %4, %2, %cst_6 {dimension_numbers = #tpu.dot_dimension_numbers<[2], [0], [0, 1], [1], [0, 0, 0, 1, 1, 1], [], []>} : vector<3x8x12xf32>, vector<12x8xf32>, vector<3x8x8xf32> -> vector<3x8x8xf32>
    "tpu.trace_stop"() : () -> ()
    %c0_7 = arith.constant 0 : index
    %c0_8 = arith.constant 0 : index
    %c0_9 = arith.constant 0 : index
    %6 = vector.load %arg5[%c0_7, %c0_8, %c0_9] : memref<3x8x8xf32, #tpu.memory_space<vmem>>, vector<3x8x8xf32>
    tpu.vector_store %arg5[%c0_7, %c0_8, %c0_9], %5 {strides = array<i32>} : memref<3x8x8xf32, #tpu.memory_space<vmem>>, vector<3x8x8xf32>,
    return
  }
  func.func @transform_0(%arg0: i32, %arg1: i32) -> (i32, i32, i32) {
    %c0_i32 = arith.constant 0 : i32
    %c0_i32_0 = arith.constant 0 : i32
    %c0_i32_1 = arith.constant 0 : i32
    return %arg0, %c0_i32, %c0_i32_0 : i32, i32, i32
  }
  func.func @transform_1(%arg0: i32, %arg1: i32) -> (i32, i32) {
    %c0_i32 = arith.constant 0 : i32
    %c0_i32_0 = arith.constant 0 : i32
    return %arg1, %c0_i32 : i32, i32
  }
  func.func @transform_2(%arg0: i32, %arg1: i32) -> (i32, i32) {
    %c0_i32 = arith.constant 0 : i32
    %c0_i32_0 = arith.constant 0 : i32
    %c0_i32_1 = arith.constant 0 : i32
    return %c0_i32, %c0_i32_0 : i32, i32
  }
  func.func @transform_3(%arg0: i32, %arg1: i32) -> (i32, i32, i32) {
    %c0_i32 = arith.constant 0 : i32
    %c0_i32_0 = arith.constant 0 : i32
    return %arg0, %arg1, %c0_i32 : i32, i32, i32
  }
}

</mosaic_0001>

<bundles_post_ra>
// kernel: tpu_custom_call.1
= control target key start
LH: loop header
LB: loop body
LE: loop exit
PB: predicated region body
PF: predicated region fallthrough
CT: control target
= control target key end

     0   :  { %8 = vsyncpa [#allocation3], 0  ;;  %s654_s0 = inlined_call_operand.hbm [shape: f32[3,16,12], index: 0, kind: input, shape index: {}]   ;;  %s655_s1 = inlined_call_operand.vmem [shape: f32[8,16], index: 1, kind: input, shape index: {}]   ;;  %s656_s2 = inlined_call_operand.vmem [shape: f32[12,8], index: 2, kind: input, shape index: {}]   ;;  %s657_s3 = inlined_call_operand.hbm [shape: f32[3,8,8], index: 3, kind: output, shape index: {}]  }
   0x1   :  { %9 = vsyncpa [#allocation4], 0  ;;  %s580_s12 = smov [#allocation2]  }
   0x2   :  { %s15_s13 = sshll.u32 %s580_s12, 4  ;;  %s16_s13 = int_to_ptr.vmem [resolvable:$true] %s15_s13 }
   0x3   :  { %s544_s14 = scalar_lea.vmem %s16_s13, 768  ;;  %p549_p1 = scmp.lt.s32.totalorder %s16_s13, %s16_s13 }
   0x4   :  { %p545_p0 = scmp.ne.s32.totalorder %s16_s13, %s544_s14  ;;  %p550_p2 = scmp.lt.s32.totalorder %s544_s14, %s544_s14 }
   0x6   :  { %p551_p3 = por %p550_p2, %p549_p1 }
   0x8   :  { %p552_p4 = pnand %p551_p3, %p545_p0 }
   0xa   :  { %555 = shalt.err (!%p552_p4)
}
   0xb   :  { %s581_s15 = smov 128   ;;  %s582_s16 = smov 8  }
   0xc   :  { %21 = dma.hbm_to_vmem [thread:$0]  %s654_s0, 768, %s16_s13, [#allocation3], %s581_s15, %s581_s15, %s582_s16  }
   0xd   :  { %576 = dma.done.wait [#allocation3], 768  }
   0xe   :  { %577 = vsyncadd [#allocation3], 4294966528  ;;  %v583_v0 = vmov 0.0   ;;  %v29_v1 = vld [vmem:[#allocation2] sm:$0xff]  ;;  %v31_v2 = vld [vmem:[#allocation2 + $0x10] sm:$0xff]  ;;  %vm147_vm0 = vcmask 130048  }
   0xf   :  { %498 = vmatprep.subr.mxu0 %v583_v0  ;;  %528 = vmatprep.subr.mxu1 %v583_v0  ;;  %v30_v3 = vld [vmem:[#allocation2 + $0x8] sm:$0xff]  ;;  %v32_v4 = vld [vmem:[#allocation2 + $0x18] sm:$0xff]  ;;  %v35_v5 = vld [vmem:[%s655_s1] sm:$0xff]  ;;  %vm584_vm1 = vmmov 0   ;;  %vm372_vm2 = vcmask 1043456   ;;  %vm362_vm3 = vcmask 97280  }
  0x10   :  { %38 = vxpose.xlu0.b32.start [1/2] (short) (narrow) %v29_v1, 16  ;;  %70 = vxpose.xlu1.b32.start [1/2] (short) (narrow) %v31_v2, 16  ;;  %v33_v6 = vld [vmem:[#allocation2 + $0x20] sm:$0xff]  ;;  %v34_v7 = vld [vmem:[#allocation2 + $0x28] sm:$0xff]  ;;  %vm456_vm4 = vcmask 64512  }
  0x11   :  { %500 = vmatprep.mubr.msk.f32.mxu0 %vm584_vm1, %v583_v0  ;;  %512 = vmatprep.mubr.msk.f32.mxu1 %vm584_vm1, %v583_v0  ;;  %v37_v21 = vld [vmem:[%s656_s2 + $0x8] sm:$0xf]  ;;  %v36_v24 = vld [vmem:[%s656_s2] sm:$0xff]  ;;  %s585_s2 = smov [#allocation5]  }
  0x12   :  { %499 = vmatpush3.xpose.msk.msra.mxu0 %vm147_vm0, %v35_v5  ;;  %529 = vmatpush3.xpose.msk.msra.mxu1 %vm147_vm0, %v35_v5  ;;  %s465_s23 = sshll.u32 %s585_s2, 4  ;;  %s466_s23 = int_to_ptr.vmem [resolvable:$true] %s465_s23 }
  0x13   :  { %515 = vmatprep.subr.mxu1 %v583_v0  ;;  %s556_s24 = scalar_lea.vmem %s466_s23, 384  ;;  %p561_p6 = scmp.lt.s32.totalorder %s466_s23, %s466_s23 }
  0x14   :  { %39 = vxpose.xlu0.b32.end [2/2] (short) (narrow) %v30_v3, 16  ;;  %71 = vxpose.xlu1.b32.end [2/2] (short) (narrow) %v32_v4, 16  ;;  %p557_p5 = scmp.ne.s32.totalorder %s466_s23, %s556_s24  ;;  %p562_p7 = scmp.lt.s32.totalorder %s556_s24, %s556_s24 }
  0x16   :  { %p563_p8 = por %p562_p7, %p561_p6 }
  0x18   :  { %102 = vxpose.xlu0.b32.start [1/2] (short) (narrow) %v33_v6, 16  ;;  %p564_p9 = pnand %p563_p8, %p557_p5 }
  0x1c   :  { %103 = vxpose.xlu0.b32.end [2/2] (short) (narrow) %v34_v7, 16 }
  0x8c   :  { %v54_v8 = vpop.trf.xlu0  ;;  %v86_v10 = vpop.trf.xlu1 }
  0x8d   :  { %v140_v9 = vcombine.high %v54_v8, %v54_v8  ;;  %v141_v14 = vcombine.high %v86_v10, %v86_v10 }
  0x8f   :  { %v143_v11 = vcombine.low %v54_v8, %v140_v9 }
  0x90   :  { %v55_v12 = vpop.trf.xlu0  ;;  %v87_v15 = vpop.trf.xlu1 }
  0x91   :  { %501 = vmatmul.mubr.msk.f32.vlgmr.msra.gmra.mxu0 %vm147_vm0, %v143_v11  ;;  %v144_v13 = vcombine.low %v55_v12, %v86_v10  ;;  %v145_v17 = vcombine.low %v141_v14, %v87_v15 }
  0x92   :  { %503 = vmatprep.mubr.msk.f32.mxu0 %vm584_vm1, %v583_v0 }
  0x94   :  { %v118_v16 = vpop.trf.xlu0 }
  0x95   :  { %504 = vmatmul.mubr.msk.f32.gmra.mxu0 %vm147_vm0, %v144_v13  ;;  %v142_v18 = vcombine.high %v118_v16, %v118_v16 }
  0x96   :  { %506 = vmatprep.mubr.msk.f32.mxu0 %vm584_vm1, %v583_v0 }
  0x97   :  { %v146_v20 = vcombine.low %v118_v16, %v142_v18 }
  0x98   :  { %v119_v19 = vpop.trf.xlu0 }
  0x99   :  { %507 = vmatmul.mubr.msk.f32.gmra.mxu0 %vm147_vm0, %v145_v17  ;;  %513 = vmatmul.mubr.msk.f32.vlgmr.msra.gmra.mxu1 %vm147_vm0, %v119_v19 }
  0x9a   :  { %509 = vmatprep.mubr.msk.f32.mxu0 %vm584_vm1, %v583_v0  ;;  %519 = vmatprep.mubr.msk.f32.mxu1 %vm584_vm1, %v583_v0 }
  0x9b   :  { %516 = vmatpush3.msk.msra.mxu1 %vm372_vm2, %v37_v21 }
  0x9c   :  { %517 = vmatprep.subr.mxu1 %v583_v0 }
  0x9d   :  { %510 = vmatmul.mubr.msk.f32.gmra.mxu0 %vm147_vm0, %v146_v20  ;;  %518 = vmatpush3.msra.mxu1 %v36_v24 }
 0x151   :  { %v227_v22 = vpop.f32.mrf.mxu0 }
 0x152   :  { %v255_v23 = vcombine.high %v227_v22, %v227_v22 }
 0x153   :  { %v502_v25 = vpop.f32.mrf.mxu0 }
 0x154   :  { %v260_v26 = vcombine.low %v227_v22, %v255_v23 }
 0x155   :  { %v232_v27 = vpop.f32.mrf.mxu0 }
 0x156   :  { %266 = vxpose.xlu1.b32.start [1/2] (short) (narrow) %v260_v26, 8  ;;  %v256_v29 = vcombine.high %v232_v27, %v232_v27 }
 0x157   :  { %v505_v28 = vpop.f32.mrf.mxu0 }
 0x159   :  { %v237_v30 = vpop.f32.mrf.mxu0  ;;  %v247_v31 = vpop.f32.mrf.mxu1 }
 0x15a   :  { %267 = vxpose.xlu1.b32.end [2/2] (short) (narrow) %v232_v27, 8  ;;  %v261_v32 = vcombine.low %v256_v29, %v237_v30  ;;  %v257_v36 = vcombine.high %v237_v30, %v237_v30 }
 0x15b   :  { %v508_v33 = vpop.f32.mrf.mxu0  ;;  %v514_v34 = vpop.f32.mrf.mxu1 }
 0x15c   :  { %298 = vxpose.xlu0.b32.start [1/2] (short) (narrow) %v261_v32, 8 }
 0x15d   :  { %v242_v35 = vpop.f32.mrf.mxu0 }
 0x15e   :  { %v258_v37 = vcombine.high %v242_v35, %v242_v35 }
 0x15f   :  { %v511_v38 = vpop.f32.mrf.mxu0 }
 0x160   :  { %299 = vxpose.xlu0.b32.end [2/2] (short) (narrow) %v257_v36, 8  ;;  %v262_v39 = vcombine.low %v242_v35, %v258_v37 }
 0x162   :  { %330 = vxpose.xlu1.b32.start [1/2] (short) (narrow) %v262_v39, 8 }
 0x166   :  { %331 = vxpose.xlu1.b32.end [2/2] (short) (narrow) %v247_v31, 8 }
 0x1d2   :  { %v282_v40 = vpop.trf.xlu1 }
 0x1d3   :  { %520 = vmatmul.mubr.msk.f32.vlgmr.msra.gmra.mxu1 %vm362_vm3, %v282_v40 }
 0x1d4   :  { %522 = vmatprep.mubr.msk.f32.mxu1 %vm584_vm1, %v583_v0 }
 0x1d8   :  { %v314_v41 = vpop.trf.xlu0 }
 0x1d9   :  { %523 = vmatmul.mubr.msk.f32.gmra.mxu1 %vm362_vm3, %v314_v41 }
 0x1da   :  { %525 = vmatprep.mubr.msk.f32.mxu1 %vm584_vm1, %v583_v0 }
 0x1de   :  { %v346_v42 = vpop.trf.xlu1 }
 0x1df   :  { %526 = vmatmul.mubr.msk.f32.gmra.mxu1 %vm362_vm3, %v346_v42 }
 0x293   :  { %v442_v43 = vpop.f32.mrf.mxu1 }
 0x294   :  { %457 = vst.msk [vmem:[#allocation5] sm:$0xff] %vm456_vm4, %v442_v43 }
 0x295   :  { %v521_v44 = vpop.f32.mrf.mxu1 }
 0x299   :  { %v447_v45 = vpop.f32.mrf.mxu1 }
 0x29a   :  { %458 = vst.msk [vmem:[#allocation5 + $0x8] sm:$0xff] %vm456_vm4, %v447_v45 }
 0x29b   :  { %v524_v46 = vpop.f32.mrf.mxu1 }
 0x29f   :  { %v452_v47 = vpop.f32.mrf.mxu1 }
 0x2a0   :  { %459 = vst.msk [vmem:[#allocation5 + $0x10] sm:$0xff] %vm456_vm4, %v452_v47 }
 0x2a1   :  { %v527_v48 = vpop.f32.mrf.mxu1 }
 0x2a2   :  { %567 = shalt.err (!%p564_p9)
}
 0x2a3   :  { %471 = dma.vmem_to_hbm [thread:$0]  %s466_s23, 384, %s657_s3, [#allocation4], %s581_s15, %s581_s15, %s582_s16  }
 0x2a4   :  { %578 = dma.done.wait [#allocation4], 384  }
 0x2a5   :  { %579 = vsyncadd [#allocation4], 4294966912 }
 0x2a6   :  { %475 = vsyncpa [#allocation3], 1 }
 0x2a7   :  { %476 = vsyncpa [#allocation4], 1 }

</bundles_post_ra>
